<compile_context>
chip_gen: v7x
topology: tpu7x:2x2x1
jax: 0.10.0
libtpu: 0.0.40
codegen_flags: <defaults>
</compile_context>

<pallas_src>
import jax
import jax.numpy as jnp
from jax import lax
from jax.experimental import pallas as pl
from jax.experimental.pallas import tpu as pltpu


def _spatial_attention_kernel(x_ref, w1_ref, w2_ref, w3_ref, bs_ref, vs_ref,
                              out_ref):
    x = x_ref[...]            # (N, F, T)
    w1 = w1_ref[...]          # (1, T)
    w2 = w2_ref[...]          # (F, T)
    w3 = w3_ref[...]          # (F, 1)
    bs = bs_ref[...]          # (N, N)
    vs = vs_ref[...]          # (N, N)
    n, f, t = x.shape

    # lhs = (x . W1) @ W2 : contract T (lane reduce), then F (MXU).
    xw1 = jnp.sum(x * w1.reshape(1, 1, t), axis=-1)              # (N, F)
    lhs = jnp.dot(xw1, w2, preferred_element_type=jnp.float32)   # (N, T)

    # rhs = W3 . x : contract F (sublane reduce).  Kept as (N, T); the
    # transpose of the PyTorch code is folded into the dot_general below.
    rhs = jnp.sum(x * w3.reshape(1, f, 1), axis=1)               # (N, T)

    # product[i, j] = sum_t lhs[i, t] * rhs[j, t]
    product = lax.dot_general(lhs, rhs, (((1,), (1,)), ((), ())),
                              preferred_element_type=jnp.float32)  # (N, N)

    z = product + bs
    sig = 1.0 / (1.0 + jnp.exp(-z))                               # sigmoid
    s = jnp.dot(vs, sig, preferred_element_type=jnp.float32)      # (N, N)

    # softmax over dim=1 of (B, N, N) == axis 0 of this per-batch slice.
    m = jnp.max(s, axis=0, keepdims=True)
    e = jnp.exp(s - m)
    out_ref[...] = e / jnp.sum(e, axis=0, keepdims=True)


def spatial_attention(x, w1, w2, w3, bs, vs):
    """Mirrors Spatial_Attention_layer.forward.  x: (B, N, F, T) -> (B, N, N)."""
    b, n, f, t = x.shape
    x = x.astype(jnp.float32)
    w1_row = w1.reshape(1, t).astype(jnp.float32)
    w2_mat = w2.astype(jnp.float32)
    w3_col = w3.reshape(f, 1).astype(jnp.float32)
    bs_mat = bs.reshape(n, n).astype(jnp.float32)
    vs_mat = vs.astype(jnp.float32)

    return pl.pallas_call(
        _spatial_attention_kernel,
        out_shape=jax.ShapeDtypeStruct((b, n, n), jnp.float32),
        grid_spec=pltpu.PrefetchScalarGridSpec(
            num_scalar_prefetch=0,
            grid=(b,),
            in_specs=[
                pl.BlockSpec((None, n, f, t), lambda i: (i, 0, 0, 0)),  # x
                pl.BlockSpec((1, t), lambda i: (0, 0)),                 # W1
                pl.BlockSpec((f, t), lambda i: (0, 0)),                 # W2
                pl.BlockSpec((f, 1), lambda i: (0, 0)),                 # W3
                pl.BlockSpec((n, n), lambda i: (0, 0)),                 # bs
                pl.BlockSpec((n, n), lambda i: (0, 0)),                 # Vs
            ],
            out_specs=pl.BlockSpec((None, n, n), lambda i: (i, 0, 0)),
        ),
        compiler_params=pltpu.CompilerParams(
            dimension_semantics=("parallel",)),
    )(x, w1_row, w2_mat, w3_col, bs_mat, vs_mat)


if __name__ == "__main__":
    key = jax.random.PRNGKey(0)
    B, N, F_IN, T = 2, 16, 4, 8

    k1, k2, k3, k4, k5 = jax.random.split(key, 5)
    x = jax.random.normal(k1, (B, N, F_IN, T), jnp.float32)
    W1 = jax.random.normal(k2, (T,), jnp.float32)          # init.normal_
    W2 = jax.random.normal(k3, (F_IN, T), jnp.float32)     # init.normal_
    W3 = jax.random.normal(k4, (F_IN,), jnp.float32)       # init.normal_
    bs = jnp.zeros((1, N, N), jnp.float32)                 # init.zeros_
    Vs = jax.random.normal(k5, (N, N), jnp.float32)

    out = spatial_attention(x, W1, W2, W3, bs, Vs)
    jax.block_until_ready(out)

    # Plain-JAX reference of the PyTorch forward.
    lhs_ref = jnp.einsum('bnft,t->bnf', x, W1)
    lhs_ref = jnp.einsum('bnf,ft->bnt', lhs_ref, W2)
    rhs_ref = jnp.einsum('f,bnft->bnt', W3, x)
    product_ref = jnp.einsum('bit,bjt->bij', lhs_ref, rhs_ref)
    S_ref = jnp.einsum('ij,bjk->bik', Vs, jax.nn.sigmoid(product_ref + bs))
    ref = jax.nn.softmax(S_ref, axis=1)

    assert out.shape == (B, N, N)
    assert jnp.allclose(out, ref, rtol=1e-4, atol=1e-5), \
        float(jnp.max(jnp.abs(out - ref)))

    print("KERNEL_OK")
</pallas_src>

<mosaic_0001>
module attributes {stable_mosaic.version = 11 : i64} {
  func.func @_spatial_attention_kernel(%arg0: i32, %arg1: memref<1x16x4x8xf32, #tpu.memory_space<vmem>>, %arg2: memref<1x8xf32, #tpu.memory_space<vmem>>, %arg3: memref<4x8xf32, #tpu.memory_space<vmem>>, %arg4: memref<4x1xf32, #tpu.memory_space<vmem>>, %arg5: memref<16x16xf32, #tpu.memory_space<vmem>>, %arg6: memref<16x16xf32, #tpu.memory_space<vmem>>, %arg7: memref<1x16x16xf32, #tpu.memory_space<vmem>>) attributes {dimension_semantics = [#tpu.dimension_semantics<parallel>], iteration_bounds = array<i64: 2>, scalar_prefetch = 0 : i64, scratch_operands = 0 : i64, tpu.core_type = #tpu.core_type<tc>, window_params = [{transform_indices = @transform_0, window_bounds = array<i64: 1, 16, 4, 8>}, {pipeline_mode = #tpu.pipeline_mode<synchronous>, transform_indices = @transform_1, window_bounds = array<i64: 1, 8>}, {pipeline_mode = #tpu.pipeline_mode<synchronous>, transform_indices = @transform_2, window_bounds = array<i64: 4, 8>}, {pipeline_mode = #tpu.pipeline_mode<synchronous>, transform_indices = @transform_3, window_bounds = array<i64: 4, 1>}, {pipeline_mode = #tpu.pipeline_mode<synchronous>, transform_indices = @transform_4, window_bounds = array<i64: 16, 16>}, {pipeline_mode = #tpu.pipeline_mode<synchronous>, transform_indices = @transform_5, window_bounds = array<i64: 16, 16>}, {transform_indices = @transform_6, window_bounds = array<i64: 1, 16, 16>}]} {
    %c0 = arith.constant 0 : index
    %c0_0 = arith.constant 0 : index
    %c0_1 = arith.constant 0 : index
    %c0_2 = arith.constant 0 : index
    %0 = vector.load %arg1[%c0, %c0_0, %c0_1, %c0_2] : memref<1x16x4x8xf32, #tpu.memory_space<vmem>>, vector<1x16x4x8xf32>
    %1 = vector.shape_cast %0 : vector<1x16x4x8xf32> to vector<16x4x8xf32>
    %c0_3 = arith.constant 0 : index
    %c0_4 = arith.constant 0 : index
    %2 = vector.load %arg2[%c0_3, %c0_4] : memref<1x8xf32, #tpu.memory_space<vmem>>, vector<1x8xf32>
    %c0_5 = arith.constant 0 : index
    %c0_6 = arith.constant 0 : index
    %3 = vector.load %arg3[%c0_5, %c0_6] : memref<4x8xf32, #tpu.memory_space<vmem>>, vector<4x8xf32>
    %c0_7 = arith.constant 0 : index
    %c0_8 = arith.constant 0 : index
    %4 = vector.load %arg4[%c0_7, %c0_8] : memref<4x1xf32, #tpu.memory_space<vmem>>, vector<4x1xf32>
    %c0_9 = arith.constant 0 : index
    %c0_10 = arith.constant 0 : index
    %5 = vector.load %arg5[%c0_9, %c0_10] : memref<16x16xf32, #tpu.memory_space<vmem>>, vector<16x16xf32>
    %c0_11 = arith.constant 0 : index
    %c0_12 = arith.constant 0 : index
    %6 = vector.load %arg6[%c0_11, %c0_12] : memref<16x16xf32, #tpu.memory_space<vmem>>, vector<16x16xf32>
    %7 = vector.shape_cast %2 : vector<1x8xf32> to vector<1x1x8xf32>
    %8 = vector.broadcast %7 : vector<1x1x8xf32> to vector<16x4x8xf32>
    %9 = arith.mulf %1, %8 : vector<16x4x8xf32>
    %cst = arith.constant dense<0.000000e+00> : vector<16x4xf32>
    %10 = vector.multi_reduction <add>, %9, %cst [2] : vector<16x4x8xf32> to vector<16x4xf32>
    %cst_13 = arith.constant dense<0.000000e+00> : vector<16x8xf32>
    %11 = tpu.matmul %10, %3, %cst_13 {dimension_numbers = #tpu.dot_dimension_numbers<[1], [0], [0], [1], [0, 0, 1, 1], [], []>} : vector<16x4xf32>, vector<4x8xf32>, vector<16x8xf32> -> vector<16x8xf32>
    %12 = vector.shape_cast %4 : vector<4x1xf32> to vector<1x4x1xf32>
    %13 = vector.broadcast %12 : vector<1x4x1xf32> to vector<16x4x8xf32>
    %14 = arith.mulf %1, %13 : vector<16x4x8xf32>
    %cst_14 = arith.constant dense<0.000000e+00> : vector<16x8xf32>
    %15 = vector.multi_reduction <add>, %14, %cst_14 [1] : vector<16x4x8xf32> to vector<16x8xf32>
    %cst_15 = arith.constant dense<0.000000e+00> : vector<16x16xf32>
    %16 = tpu.matmul %11, %15, %cst_15 {dimension_numbers = #tpu.dot_dimension_numbers<[1], [1], [0], [0], [0, 0, 1, 0], [], []>} : vector<16x8xf32>, vector<16x8xf32>, vector<16x16xf32> -> vector<16x16xf32>
    %17 = arith.addf %16, %5 : vector<16x16xf32>
    %cst_16 = arith.constant 0.000000e+00 : f32
    %18 = vector.broadcast %cst_16 : f32 to vector<16x16xf32>
    %19 = arith.subf %18, %17 : vector<16x16xf32>
    %20 = math.exp %19 : vector<16x16xf32>
    %cst_17 = arith.constant 1.000000e+00 : f32
    %21 = vector.broadcast %cst_17 : f32 to vector<16x16xf32>
    %22 = arith.addf %21, %20 : vector<16x16xf32>
    %cst_18 = arith.constant 1.000000e+00 : f32
    %23 = vector.broadcast %cst_18 : f32 to vector<16x16xf32>
    %24 = arith.divf %23, %22 : vector<16x16xf32>
    %cst_19 = arith.constant dense<0.000000e+00> : vector<16x16xf32>
    %25 = tpu.matmul %6, %24, %cst_19 {dimension_numbers = #tpu.dot_dimension_numbers<[1], [0], [0], [1], [0, 0, 1, 1], [], []>} : vector<16x16xf32>, vector<16x16xf32>, vector<16x16xf32> -> vector<16x16xf32>
    %cst_20 = arith.constant dense<0xFF800000> : vector<16xf32>
    %26 = vector.multi_reduction <maximumf>, %25, %cst_20 [0] : vector<16x16xf32> to vector<16xf32>
    %27 = vector.shape_cast %26 : vector<16xf32> to vector<1x16xf32>
    %28 = vector.broadcast %27 : vector<1x16xf32> to vector<16x16xf32>
    %29 = arith.subf %25, %28 : vector<16x16xf32>
    %30 = math.exp %29 : vector<16x16xf32>
    %cst_21 = arith.constant dense<0.000000e+00> : vector<16xf32>
    %31 = vector.multi_reduction <add>, %30, %cst_21 [0] : vector<16x16xf32> to vector<16xf32>
    %32 = vector.shape_cast %31 : vector<16xf32> to vector<1x16xf32>
    %33 = vector.broadcast %32 : vector<1x16xf32> to vector<16x16xf32>
    %34 = arith.divf %30, %33 : vector<16x16xf32>
    %c0_22 = arith.constant 0 : index
    %c0_23 = arith.constant 0 : index
    %c0_24 = arith.constant 0 : index
    %35 = vector.load %arg7[%c0_22, %c0_23, %c0_24] : memref<1x16x16xf32, #tpu.memory_space<vmem>>, vector<1x16x16xf32>
    %36 = vector.shape_cast %35 : vector<1x16x16xf32> to vector<16x16xf32>
    %37 = vector.shape_cast %34 : vector<16x16xf32> to vector<1x16x16xf32>
    tpu.vector_store %arg7[%c0_22, %c0_23, %c0_24], %37 {strides = array<i32>} : memref<1x16x16xf32, #tpu.memory_space<vmem>>, vector<1x16x16xf32>,
    return
  }
  func.func @transform_0(%arg0: i32) -> (i32, i32, i32, i32) {
    %c0_i32 = arith.constant 0 : i32
    %c0_i32_0 = arith.constant 0 : i32
    %c0_i32_1 = arith.constant 0 : i32
    %c0_i32_2 = arith.constant 0 : i32
    return %arg0, %c0_i32, %c0_i32_0, %c0_i32_1 : i32, i32, i32, i32
  }
  func.func @transform_1(%arg0: i32) -> (i32, i32) {
    %c0_i32 = arith.constant 0 : i32
    %c0_i32_0 = arith.constant 0 : i32
    %c0_i32_1 = arith.constant 0 : i32
    return %c0_i32, %c0_i32_0 : i32, i32
  }
  func.func @transform_2(%arg0: i32) -> (i32, i32) {
    %c0_i32 = arith.constant 0 : i32
    %c0_i32_0 = arith.constant 0 : i32
    %c0_i32_1 = arith.constant 0 : i32
    return %c0_i32, %c0_i32_0 : i32, i32
  }
  func.func @transform_3(%arg0: i32) -> (i32, i32) {
    %c0_i32 = arith.constant 0 : i32
    %c0_i32_0 = arith.constant 0 : i32
    %c0_i32_1 = arith.constant 0 : i32
    return %c0_i32, %c0_i32_0 : i32, i32
  }
  func.func @transform_4(%arg0: i32) -> (i32, i32) {
    %c0_i32 = arith.constant 0 : i32
    %c0_i32_0 = arith.constant 0 : i32
    %c0_i32_1 = arith.constant 0 : i32
    return %c0_i32, %c0_i32_0 : i32, i32
  }
  func.func @transform_5(%arg0: i32) -> (i32, i32) {
    %c0_i32 = arith.constant 0 : i32
    %c0_i32_0 = arith.constant 0 : i32
    %c0_i32_1 = arith.constant 0 : i32
    return %c0_i32, %c0_i32_0 : i32, i32
  }
  func.func @transform_6(%arg0: i32) -> (i32, i32, i32) {
    %c0_i32 = arith.constant 0 : i32
    %c0_i32_0 = arith.constant 0 : i32
    %c0_i32_1 = arith.constant 0 : i32
    return %arg0, %c0_i32, %c0_i32_0 : i32, i32, i32
  }
}

</mosaic_0001>

<bundles_post_ra>
// kernel: tpu_custom_call.1
= control target key start
LH: loop header
LB: loop body
LE: loop exit
PB: predicated region body
PF: predicated region fallthrough
CT: control target
= control target key end

     0   :  { %11 = vsyncpa [#allocation3], 0  ;;  %s1501_s0 = inlined_call_operand.vmem [shape: f32[2,16,4,8], index: 0, kind: input, shape index: {}]   ;;  %s1502_s1 = inlined_call_operand.vmem [shape: f32[1,8], index: 1, kind: input, shape index: {}]   ;;  %s1503_s2 = inlined_call_operand.vmem [shape: f32[4,8], index: 2, kind: input, shape index: {}]   ;;  %s1504_s3 = inlined_call_operand.vmem [shape: f32[4,1], index: 3, kind: input, shape index: {}]   ;;  %s1505_s4 = inlined_call_operand.vmem [shape: f32[16,16], index: 4, kind: input, shape index: {}]   ;;  %s1506_s5 = inlined_call_operand.vmem [shape: f32[16,16], index: 5, kind: input, shape index: {}]   ;;  %s1507_s6 = inlined_call_operand.hbm [shape: f32[2,16,16], index: 6, kind: output, shape index: {}]  }
   0x1   :  { %13 = vsyncpa [#allocation3 + $0x1], 0  ;;  %s1203_s21 = smov 0   ;;  %s1205_s22 = smov 0  }
   0x2   :  { %s1207_s23 = smov 0   ;;  %s1209_s24 = smov 0  }
   0x3 LB: > { %s1224_s25 = sadd.s32 4294967295, %s1162_s24   ;;  %s979_s26 = sadd.s32 4294967294, %s1162_s24   ;;  %s1162_s24 = sphi %s1209_s24, %s1513_s24   ;;  %s1158_s23 = sphi %s1207_s23, %s1512_s23   ;;  %s1154_s22 = sphi %s1205_s22, %s1511_s22   ;;  %s1150_s21 = sphi %s1203_s21, %s1510_s21  }
   0x4   : > { %s1228_s27 = sadd.s32 1, %s1162_s24   ;;  %s157_s28 = sadd.s32 1, %s1158_s23 }
   0x5   : > { %s154_s29 = ssub.s32 %s1162_s24, %s1228_s27  ;;  %p167_p0 = scmp.ne.s32.totalorder %s1158_s23, %s1154_s22 }
   0x6   : > { %p155_p1 = scmp.eq.s32.totalorder %s154_s29, 0  ;;  %p168_p2 = scmp.eq.s32.totalorder %s1224_s25, 1 }
   0x7   : > { %p173_p3 = scmp.ne.s32.totalorder %s1154_s22, %s1150_s21  ;;  %p174_p4 = scmp.eq.s32.totalorder %s979_s26, 1 }
   0x8   : > { %s1239_s30 = scalar_select %p155_p1, %s1158_s23, %s157_s28  }
   0x9   : > { %p1241_p5 = por %p168_p2, %p167_p0  ;;  %p1245_p6 = por %p174_p4, %p173_p3 }
   0xa   : > { %p982_p7 = scmp.ge.s32.totalorder %s1162_s24, 1  ;;  %p215_p8 = scmp.lt.s32.totalorder %s1162_s24, 3 }
   0xc   : > { %p216_p9 = pnand %p982_p7, %p215_p8 }
   0xd   : > { %p245_p10 = scmp.lt.s32.totalorder (!%p216_p9), %s1224_s25, 1  ;;  %v986_v0 = vld [vmem:[%s1502_s1] ss:$0 sm:$0xff] (!%p216_p9)  ;;  %vm295_vm0 = vcmask (!%p216_p9), 60416   ;;  %vm452_vm1 = vcmask (!%p216_p9), 1043456   ;;  %v1164_v50 = vmov (!%p216_p9), 0   ;;  %v360_v56 = vlaneseq (!%p216_p9) }
   0xe   : > { %219 = sbr.rel (%p216_p9) target bundleno = 953 (0x3b9), region = 44  ;;  %v267_v49 = vld [vmem:[%s1503_s2] sm:$0xf] (!%p216_p9)  ;;  %1085 = vset.pattern.permute.xlu0 (!%p216_p9), %v1164_v50  ;;  %vm426_vm2 = vcmask (!%p216_p9), 1041409   ;;  %vm428_vm3 = vcmask (!%p216_p9), 1042434   ;;  %vm430_vm4 = vcmask (!%p216_p9), 1043459  }
   0xf   : > { %1014 = vmatprep.subr.msk.mxu0 (!%p216_p9), %vm452_vm1, %v267_v49  ;;  %v268_v51 = vld [vmem:[%s1504_s3] sm:$0xf] (!%p216_p9)  ;;  %v361_v59 = vand.u32 (!%p216_p9), 127, %v360_v56  ;;  %v363_v60 = vshrl.u32 (!%p216_p9), %v360_v56, 7  ;;  %vm432_vm5 = vcmask (!%p216_p9), 1044484   ;;  %vm434_vm6 = vcmask (!%p216_p9), 1045509  }
  0x10   : > { %1015 = vmatpush3.msk.msra.mxu0 (!%p216_p9), %vm452_vm1, %v267_v49  ;;  %vm436_vm7 = vcmask (!%p216_p9), 1046534   ;;  %vm438_vm8 = vcmask (!%p216_p9), 1047559   ;;  %vm447_vm9 = vcmask (!%p216_p9), 31744   ;;  %vm694_vm10 = vcmask (!%p216_p9), 64512   ;;  %s242_s13 = sand.u32 (!%p216_p9), 1, %s1154_s22   ;;  %s1165_s28 = smov (!%p216_p9), [#allocation2]  }
  0x11   : > { %v364_v63 = vsub.s32 (!%p216_p9), %v361_v59, %v363_v60  ;;  %vm1034_vm11 = vmpackc.low (!%p216_p9), %vm694_vm10, %vm694_vm10  ;;  %vm792_vm12 = vcmask (!%p216_p9), 130048   ;;  %s983_s14 = sshll.u32 (!%p216_p9), %s242_s13, 4  ;;  %s1104_s29 = sshll.u32 (!%p216_p9), %s1165_s28, 4  ;;  %s1105_s29 = int_to_ptr.vmem [resolvable:$false] %s1104_s29 }
  0x12   : > { %s244_s16 = scalar_lea.vmem (!%p216_p9), [#allocation2], %s983_s14 }
  0x13   : > { %s917_s17 = sshll.u32 (!%p216_p9), %s244_s16, 4  ;;  %s1456_s17 = int_to_ptr.vmem [resolvable:$true] %s917_s17 }
  0x14   : > { %s1100_s26 = scalar_lea.vmem (!%p216_p9), %s1456_s17, 256  ;;  %p1107_p0 = scmp.lt.s32.totalorder (!%p216_p9), %s1456_s17, %s1105_s29 }
  0x15   : > { %s246_s9 = scalar_select %p245_p10, %s1224_s25, 1 }
  0x16   : > { %p1101_p11 = scmp.ne.s32.totalorder %s1456_s17, %s1100_s26 }
  0x17   : > { %s1001_s10 = sshll.u32 %s246_s9, 6  ;;  %s1106_s9 = scalar_lea.vmem %s1105_s29, 512 }
  0x18   : > { %s1259_s15 = scalar_lea.vmem %s1501_s0, %s1001_s10  ;;  %p1102_p12 = pnand %p1101_p11, %p1241_p5 }
  0x19   : > { %v1262_v1 = vld [vmem:[%s1259_s15 + $0x8] sm:$0xf]  ;;  %v1265_v2 = vld [vmem:[%s1259_s15] sm:$0xf]  ;;  %v1274_v7 = vld [vmem:[%s1259_s15 + $0x4] sm:$0xf]  ;;  %p1108_p1 = scmp.lt.s32.totalorder %s1106_s9, %s1100_s26 }
  0x1a   : > { %v1268_v3 = vld [vmem:[%s1259_s15 + $0x20] sm:$0xf]  ;;  %v281_v4 = vmul.f32 %v986_v0, %v1262_v1  ;;  %v279_v5 = vmul.f32 %v986_v0, %v1265_v2  ;;  %v280_v8 = vmul.f32 %v986_v0, %v1274_v7  ;;  %v1278_v9 = vld [vmem:[%s1259_s15 + $0xc] sm:$0xf]  ;;  %v1281_v10 = vld [vmem:[%s1259_s15 + $0x24] sm:$0xf]  ;;  %p1103_p13 = pneg %p1102_p12 }
  0x1b   : > { %v287_v6 = vmul.f32 %v986_v0, %v1268_v3  ;;  %v282_v15 = vmul.f32 %v986_v0, %v1278_v9  ;;  %v288_v16 = vmul.f32 %v986_v0, %v1281_v10  ;;  %v1290_v17 = vld [vmem:[%s1259_s15 + $0x10] sm:$0xf]  ;;  %v1293_v18 = vld [vmem:[%s1259_s15 + $0x28] sm:$0xf]  ;;  %v1300_v23 = vld [vmem:[%s1259_s15 + $0x14] sm:$0xf]  ;;  %p1109_p2 = por %p1108_p1, %p1107_p0 }
  0x1c   : > { %v302_v11 = vsel %vm295_vm0, %v281_v4, 0.0  ;;  %v296_v12 = vsel %vm295_vm0, %v279_v5, 0.0  ;;  %v299_v14 = vsel %vm295_vm0, %v280_v8, 0.0  ;;  %v283_v21 = vmul.f32 %v986_v0, %v1290_v17  ;;  %v1303_v24 = vld [vmem:[%s1259_s15 + $0x2c] sm:$0xf] }
  0x1d   : > { %303 = vadd.xlane.f32.xlu1 %v302_v11  ;;  %297 = vadd.xlane.f32.xlu0 %v296_v12  ;;  %v320_v13 = vsel %vm295_vm0, %v287_v6, 0.0  ;;  %v305_v19 = vsel %vm295_vm0, %v282_v15, 0.0  ;;  %v323_v20 = vsel %vm295_vm0, %v288_v16, 0.0  ;;  %v289_v22 = vmul.f32 %v986_v0, %v1293_v18  ;;  %v1310_v29 = vld [vmem:[%s1259_s15 + $0x18] sm:$0xf]  ;;  %p1110_p3 = pnand %p1109_p2, %p1103_p13 }
  0x1e   : > { %v308_v25 = vsel %vm295_vm0, %v283_v21, 0.0  ;;  %v284_v27 = vmul.f32 %v986_v0, %v1300_v23  ;;  %v290_v28 = vmul.f32 %v986_v0, %v1303_v24  ;;  %v1313_v30 = vld [vmem:[%s1259_s15 + $0x30] sm:$0xf]  ;;  %v285_v33 = vmul.f32 %v986_v0, %v1310_v29  ;;  %v1320_v35 = vld [vmem:[%s1259_s15 + $0x1c] sm:$0xf] }
  0x1f   : > { %v326_v26 = vsel %vm295_vm0, %v289_v22, 0.0  ;;  %v291_v34 = vmul.f32 %v986_v0, %v1313_v30  ;;  %v1323_v36 = vld [vmem:[%s1259_s15 + $0x34] sm:$0xf]  ;;  %v286_v39 = vmul.f32 %v986_v0, %v1320_v35  ;;  %v1330_v41 = vld [vmem:[%s1259_s15 + $0x38] sm:$0xf] }
  0x20   : > { %v311_v31 = vsel %vm295_vm0, %v284_v27, 0.0  ;;  %v329_v32 = vsel %vm295_vm0, %v290_v28, 0.0  ;;  %v314_v37 = vsel %vm295_vm0, %v285_v33, 0.0  ;;  %v292_v40 = vmul.f32 %v986_v0, %v1323_v36  ;;  %v1333_v42 = vld [vmem:[%s1259_s15 + $0x3c] sm:$0xf]  ;;  %s1002_s15 = sshll.u32 %s1224_s25, 8 }
  0x21   : > { %321 = vadd.xlane.f32.xlu1 %v320_v13  ;;  %300 = vadd.xlane.f32.xlu0 %v299_v14  ;;  %v332_v38 = vsel %vm295_vm0, %v291_v34, 0.0  ;;  %v317_v43 = vsel %vm295_vm0, %v286_v39, 0.0  ;;  %v293_v45 = vmul.f32 %v986_v0, %v1330_v41  ;;  %v294_v46 = vmul.f32 %v986_v0, %v1333_v42  ;;  %s1454_s20 = scalar_lea.hbm %s1507_s6, %s1002_s15  ;;  %s1460_s25 = scalar_lea.sflag [#allocation3], %s242_s13 }
  0x22   : > { %v335_v44 = vsel %vm295_vm0, %v292_v40, 0.0 }
  0x23   : > { %v338_v47 = vsel %vm295_vm0, %v293_v45, 0.0  ;;  %v341_v48 = vsel %vm295_vm0, %v294_v46, 0.0 }
  0x25   : > { %306 = vadd.xlane.f32.xlu1 %v305_v19  ;;  %324 = vadd.xlane.f32.xlu0 %v323_v20 }
  0x29   : > { %309 = vadd.xlane.f32.xlu1 %v308_v25  ;;  %327 = vadd.xlane.f32.xlu0 %v326_v26 }
  0x2d   : > { %312 = vadd.xlane.f32.xlu1 %v311_v31  ;;  %330 = vadd.xlane.f32.xlu0 %v329_v32 }
  0x31   : > { %315 = vadd.xlane.f32.xlu1 %v314_v37  ;;  %333 = vadd.xlane.f32.xlu0 %v332_v38 }
  0x35   : > { %318 = vadd.xlane.f32.xlu1 %v317_v43  ;;  %336 = vadd.xlane.f32.xlu0 %v335_v44 }
  0x39   : > { %339 = vadd.xlane.f32.xlu0 %v338_v47  ;;  %342 = vadd.xlane.f32.xlu1 %v341_v48 }
  0x4f   : > { %533 = vperm.xlu0 %1085, %v268_v51  }
  0xaa   : > { %v304_v52 = vpop.xlane.xlu1 %303  ;;  %v298_v53 = vpop.xlane.xlu0 %297 }
  0xab   : > { %v365_v6 = vrot.slane %v298_v53, %v364_v63  ;;  %v373_v12 = vrot.slane %v304_v52, %v364_v63 }
  0xae   : > { %v322_v54 = vpop.xlane.xlu1 %321  ;;  %v301_v55 = vpop.xlane.xlu0 %300 }
  0xaf   : > { %v369_v0 = vrot.slane %v301_v55, %v364_v63  ;;  %v397_v26 = vrot.slane %v322_v54, %v364_v63 }
  0xb1   : > { %v427_v8 = vsel %vm426_vm2, %v369_v0, %v365_v6 }
  0xb2   : > { %v307_v57 = vpop.xlane.xlu1 %306  ;;  %v325_v58 = vpop.xlane.xlu0 %324  ;;  %v429_v19 = vsel %vm428_vm3, %v373_v12, %v427_v8 }
  0xb3   : > { %v377_v11 = vrot.slane %v307_v57, %v364_v63  ;;  %v401_v20 = vrot.slane %v325_v58, %v364_v63 }
  0xb5   : > { %v431_v22 = vsel %vm430_vm4, %v377_v11, %v429_v19  ;;  %v440_v38 = vsel %vm426_vm2, %v401_v20, %v397_v26 }
  0xb6   : > { %v310_v61 = vpop.xlane.xlu1 %309  ;;  %v328_v62 = vpop.xlane.xlu0 %327 }
  0xb7   : > { %v381_v13 = vrot.slane %v310_v61, %v364_v63  ;;  %v405_v25 = vrot.slane %v328_v62, %v364_v63 }
  0xb9   : > { %v433_v27 = vsel %vm432_vm5, %v381_v13, %v431_v22  ;;  %v441_v43 = vsel %vm428_vm3, %v405_v25, %v440_v38 }
  0xba   : > { %v313_v4 = vpop.xlane.xlu1 %312  ;;  %v331_v5 = vpop.xlane.xlu0 %330 }
  0xbb   : > { %v385_v16 = vrot.slane %v313_v4, %v364_v63  ;;  %v409_v28 = vrot.slane %v331_v5, %v364_v63 }
  0xbd   : > { %v435_v37 = vsel %vm434_vm6, %v385_v16, %v433_v27  ;;  %v442_v45 = vsel %vm430_vm4, %v409_v28, %v441_v43 }
  0xbe   : > { %v316_v14 = vpop.xlane.xlu1 %315  ;;  %v334_v15 = vpop.xlane.xlu0 %333 }
  0xbf   : > { %v389_v21 = vrot.slane %v316_v14, %v364_v63  ;;  %v413_v33 = vrot.slane %v334_v15, %v364_v63 }
  0xc1   : > { %v437_v40 = vsel %vm436_vm7, %v389_v21, %v435_v37  ;;  %v443_v48 = vsel %vm432_vm5, %v413_v33, %v442_v45 }
  0xc2   : > { %v319_v31 = vpop.xlane.xlu1 %318  ;;  %v337_v32 = vpop.xlane.xlu0 %336 }
  0xc3   : > { %v393_v34 = vrot.slane %v319_v31, %v364_v63  ;;  %v417_v39 = vrot.slane %v337_v32, %v364_v63 }
  0xc5   : > { %v439_v44 = vsel %vm438_vm8, %v393_v34, %v437_v40  ;;  %v444_v51 = vsel %vm434_vm6, %v417_v39, %v443_v48 }
  0xc6   : > { %1016 = vmatprep.mubr.msk.f32.mxu0 %vm447_vm9, %v439_v44  ;;  %v340_v46 = vpop.xlane.xlu0 %339  ;;  %v343_v47 = vpop.xlane.xlu1 %342 }
  0xc7   : > { %v421_v49 = vrot.slane %v340_v46, %v364_v63  ;;  %v425_v50 = vrot.slane %v343_v47, %v364_v63 }
  0xc9   : > { %v445_v52 = vsel %vm436_vm7, %v421_v49, %v444_v51 }
  0xca   : > { %v446_v53 = vsel %vm438_vm8, %v425_v50, %v445_v52 }
  0xcb   : > { %1017 = vmatmul.mubr.msk.f32.vlgmr.msra.gmra.mrb[0].mxu0 %vm447_vm9, %v446_v53 }
  0xce   : > { %v534_v54 = vpop.permute.xlu0 %533 }
  0xcf   : > { %v536_v55 = vmul.f32 %v534_v54, %v1265_v2  ;;  %v537_v56 = vmul.f32 %v534_v54, %v1274_v7  ;;  %v538_v57 = vmul.f32 %v534_v54, %v1262_v1  ;;  %v539_v58 = vmul.f32 %v534_v54, %v1278_v9 }
  0xd0   : > { %v540_v59 = vmul.f32 %v534_v54, %v1290_v17  ;;  %v541_v60 = vmul.f32 %v534_v54, %v1300_v23  ;;  %v542_v61 = vmul.f32 %v534_v54, %v1310_v29  ;;  %v543_v62 = vmul.f32 %v534_v54, %v1320_v35 }
  0xd1   : > { %v544_v63 = vmul.f32 %v534_v54, %v1268_v3  ;;  %v545_v0 = vmul.f32 %v534_v54, %v1281_v10  ;;  %v546_v2 = vmul.f32 %v534_v54, %v1293_v18  ;;  %v547_v7 = vmul.f32 %v534_v54, %v1303_v24 }
  0xd2   : > { %v552_v1 = vsel %vm295_vm0, %v536_v55, 0.0  ;;  %v559_v9 = vsel %vm295_vm0, %v537_v56, 0.0  ;;  %v566_v17 = vsel %vm295_vm0, %v538_v57, 0.0  ;;  %v573_v23 = vsel %vm295_vm0, %v539_v58, 0.0 }
  0xd3   : > { %v553_v4 = vrot.slane %v552_v1, 4  ;;  %v560_v29 = vrot.slane %v559_v9, 4  ;;  %v567_v5 = vrot.slane %v566_v17, 4  ;;  %v574_v35 = vrot.slane %v573_v23, 4 }
  0xd4   : > { %v580_v3 = vsel %vm295_vm0, %v540_v59, 0.0  ;;  %v587_v10 = vsel %vm295_vm0, %v541_v60, 0.0  ;;  %v594_v18 = vsel %vm295_vm0, %v542_v61, 0.0  ;;  %v601_v24 = vsel %vm295_vm0, %v543_v62, 0.0 }
  0xd5   : > { %v554_v6 = vadd.f32 %v553_v4, %v552_v1  ;;  %v561_v8 = vadd.f32 %v560_v29, %v559_v9  ;;  %v568_v11 = vadd.f32 %v567_v5, %v566_v17  ;;  %v575_v12 = vadd.f32 %v574_v35, %v573_v23 }
  0xd6   : > { %v581_v13 = vrot.slane %v580_v3, 4  ;;  %v588_v14 = vrot.slane %v587_v10, 4  ;;  %v595_v15 = vrot.slane %v594_v18, 4  ;;  %v602_v16 = vrot.slane %v601_v24, 4 }
  0xd7   : > { %v555_v19 = vrot.slane %v554_v6, 2  ;;  %v562_v20 = vrot.slane %v561_v8, 2  ;;  %v569_v21 = vrot.slane %v568_v11, 2  ;;  %v576_v22 = vrot.slane %v575_v12, 2 }
  0xd8   : > { %v582_v25 = vadd.f32 %v581_v13, %v580_v3  ;;  %v589_v26 = vadd.f32 %v588_v14, %v587_v10  ;;  %v596_v27 = vadd.f32 %v595_v15, %v594_v18  ;;  %v603_v28 = vadd.f32 %v602_v16, %v601_v24 }
  0xd9   : > { %v556_v31 = vadd.f32 %v555_v19, %v554_v6  ;;  %v563_v32 = vadd.f32 %v562_v20, %v561_v8  ;;  %v570_v33 = vadd.f32 %v569_v21, %v568_v11  ;;  %v577_v34 = vadd.f32 %v576_v22, %v575_v12 }
  0xda   : > { %v583_v37 = vrot.slane %v582_v25, 2  ;;  %v590_v38 = vrot.slane %v589_v26, 2  ;;  %v597_v39 = vrot.slane %v596_v27, 2  ;;  %v604_v40 = vrot.slane %v603_v28, 2 }
  0xdb   : > { %v557_v43 = vrot.slane %v556_v31, 1  ;;  %v564_v44 = vrot.slane %v563_v32, 1  ;;  %v571_v45 = vrot.slane %v570_v33, 1  ;;  %v578_v46 = vrot.slane %v577_v34, 1 }
  0xdc   : > { %v1383_v47 = vadd.f32 %v583_v37, %v582_v25  ;;  %v1385_v48 = vadd.f32 %v590_v38, %v589_v26  ;;  %v1387_v49 = vadd.f32 %v597_v39, %v596_v27  ;;  %v1389_v50 = vadd.f32 %v604_v40, %v603_v28 }
  0xdd   : > { %v548_v51 = vmul.f32 %v534_v54, %v1313_v30  ;;  %v549_v52 = vmul.f32 %v534_v54, %v1323_v36  ;;  %v550_v53 = vmul.f32 %v534_v54, %v1330_v41  ;;  %v551_v55 = vmul.f32 %v534_v54, %v1333_v42 }
  0xde   : > { %v558_v56 = vadd.f32 %v557_v43, %v556_v31  ;;  %v565_v57 = vadd.f32 %v564_v44, %v563_v32  ;;  %v1395_v58 = vadd.f32 %v571_v45, %v570_v33  ;;  %v1397_v59 = vadd.f32 %v578_v46, %v577_v34 }
  0xdf   : > { %v608_v60 = vsel %vm295_vm0, %v544_v63, 0.0  ;;  %v615_v61 = vsel %vm295_vm0, %v545_v0, 0.0  ;;  %v622_v62 = vsel %vm295_vm0, %v546_v2, 0.0  ;;  %v629_v30 = vsel %vm295_vm0, %v547_v7, 0.0 }
  0xe0   : > { %v585_v36 = vrot.slane %v1383_v47, 1  ;;  %v592_v41 = vrot.slane %v1385_v48, 1  ;;  %v599_v42 = vrot.slane %v1387_v49, 1  ;;  %v606_v54 = vrot.slane %v1389_v50, 1 }
  0xe1   : > { %v609_v1 = vrot.slane %v608_v60, 4  ;;  %v616_v9 = vrot.slane %v615_v61, 4  ;;  %v623_v17 = vrot.slane %v622_v62, 4  ;;  %v630_v23 = vrot.slane %v629_v30, 4 }
  0xe2   : > { %v636_v63 = vsel %vm295_vm0, %v548_v51, 0.0  ;;  %v643_v0 = vsel %vm295_vm0, %v549_v52, 0.0  ;;  %v650_v2 = vsel %vm295_vm0, %v550_v53, 0.0  ;;  %v657_v7 = vsel %vm295_vm0, %v551_v55, 0.0 }
  0xe3   : > { %v610_v4 = vadd.f32 %v609_v1, %v608_v60  ;;  %v617_v29 = vadd.f32 %v616_v9, %v615_v61  ;;  %v624_v5 = vadd.f32 %v623_v17, %v622_v62  ;;  %v631_v35 = vadd.f32 %v630_v23, %v629_v30 }
  0xe4   : > { %v637_v3 = vrot.slane %v636_v63, 4  ;;  %v644_v10 = vrot.slane %v643_v0, 4  ;;  %v651_v18 = vrot.slane %v650_v2, 4  ;;  %v658_v24 = vrot.slane %v657_v7, 4 }
  0xe5   : > { %v611_v6 = vrot.slane %v610_v4, 2  ;;  %v618_v8 = vrot.slane %v617_v29, 2  ;;  %v625_v11 = vrot.slane %v624_v5, 2  ;;  %v632_v12 = vrot.slane %v631_v35, 2 }
  0xe6   : > { %v638_v13 = vadd.f32 %v637_v3, %v636_v63  ;;  %v645_v14 = vadd.f32 %v644_v10, %v643_v0  ;;  %v652_v15 = vadd.f32 %v651_v18, %v650_v2  ;;  %v659_v16 = vadd.f32 %v658_v24, %v657_v7 }
  0xe7   : > { %v612_v19 = vadd.f32 %v611_v6, %v610_v4  ;;  %v619_v20 = vadd.f32 %v618_v8, %v617_v29  ;;  %v626_v21 = vadd.f32 %v625_v11, %v624_v5  ;;  %v633_v22 = vadd.f32 %v632_v12, %v631_v35  ;;  %v271_v29 = vld [vmem:[%s1506_s5] sm:$0xff]  ;;  %v270_v5 = vld [vmem:[%s1505_s4 + $0x8] sm:$0xff] }
  0xe8   : > { %v639_v25 = vrot.slane %v638_v13, 2  ;;  %v646_v26 = vrot.slane %v645_v14, 2  ;;  %v653_v27 = vrot.slane %v652_v15, 2  ;;  %v660_v28 = vrot.slane %v659_v16, 2  ;;  %1030 = vmatprep.mubr.msk.f32.mxu0 %vm792_vm12, %v271_v29  ;;  %v269_v35 = vld [vmem:[%s1505_s4] sm:$0xff] }
  0xe9   : > { %v613_v31 = vrot.slane %v612_v19, 1  ;;  %v620_v32 = vrot.slane %v619_v20, 1  ;;  %v627_v33 = vrot.slane %v626_v21, 1  ;;  %v634_v34 = vrot.slane %v633_v22, 1 }
  0xea   : > { %v640_v37 = vadd.f32 %v639_v25, %v638_v13  ;;  %v647_v38 = vadd.f32 %v646_v26, %v645_v14  ;;  %v654_v39 = vadd.f32 %v653_v27, %v652_v15  ;;  %v661_v40 = vadd.f32 %v660_v28, %v659_v16 }
  0xeb   : > { %v614_v43 = vadd.f32 %v613_v31, %v612_v19  ;;  %v621_v44 = vadd.f32 %v620_v32, %v619_v20  ;;  %v628_v45 = vadd.f32 %v627_v33, %v626_v21  ;;  %v635_v46 = vadd.f32 %v634_v34, %v633_v22  ;;  %v272_v22 = vld [vmem:[%s1506_s5 + $0x8] sm:$0xff] }
  0xec   : > { %v641_v51 = vrot.slane %v640_v37, 1  ;;  %v648_v52 = vrot.slane %v647_v38, 1  ;;  %v655_v53 = vrot.slane %v654_v39, 1  ;;  %v662_v55 = vrot.slane %v661_v40, 1 }
  0xed   : > { %v586_v60 = vadd.f32 %v585_v36, %v1383_v47  ;;  %v680_v61 = vsel %vm426_vm2, %v565_v57, %v558_v56  ;;  %v687_v62 = vsel %vm426_vm2, %v621_v44, %v614_v43  ;;  %v593_v30 = vadd.f32 %v592_v41, %v1385_v48 }
  0xee   : > { %v642_v1 = vadd.f32 %v641_v51, %v640_v37  ;;  %v649_v9 = vadd.f32 %v648_v52, %v647_v38  ;;  %v600_v17 = vadd.f32 %v599_v42, %v1387_v49  ;;  %v656_v23 = vadd.f32 %v655_v53, %v654_v39 }
  0xef   : > { %v681_v63 = vsel %vm428_vm3, %v1395_v58, %v680_v61  ;;  %v688_v0 = vsel %vm428_vm3, %v628_v45, %v687_v62  ;;  %v607_v2 = vadd.f32 %v606_v54, %v1389_v50  ;;  %v663_v7 = vadd.f32 %v662_v55, %v661_v40 }
  0xf0   : > { %v682_v47 = vsel %vm430_vm4, %v1397_v59, %v681_v63  ;;  %v689_v56 = vsel %vm430_vm4, %v635_v46, %v688_v0 }
  0xf1   : > { %v683_v48 = vsel %vm432_vm5, %v586_v60, %v682_v47  ;;  %v690_v57 = vsel %vm432_vm5, %v642_v1, %v689_v56 }
  0xf2   : > { %v684_v49 = vsel %vm434_vm6, %v593_v30, %v683_v48  ;;  %v691_v36 = vsel %vm434_vm6, %v649_v9, %v690_v57 }
  0xf3   : > { %v685_v58 = vsel %vm436_vm7, %v600_v17, %v684_v49  ;;  %v692_v41 = vsel %vm436_vm7, %v656_v23, %v691_v36 }
  0xf4   : > { %v686_v50 = vsel %vm438_vm8, %v607_v2, %v685_v58  ;;  %v693_v42 = vsel %vm438_vm8, %v663_v7, %v692_v41 }
  0xf5   : > { %v1033_v59 = vpack.c.bf16 %v693_v42, %v686_v50 }
  0xf7   : > { %1035 = vmatprep.subr.msk.bf16.mxu1 %vm1034_vm11, %v1033_v59 }
  0xf8   : > { %1038 = vmatpush3.bf16.xpose.msk.msra.mxu1 %vm1034_vm11, %v1033_v59 }
 0x19e   : > { %v1018_v54 = vpop.f32.mrb[0].mxu0 }
 0x19f   : > { %v522_v4 = vpop.f32.mrb[1].mxu0 }
 0x1a0   : > { %1023 = vmatprep.mubr.msk.f32.mxu1 %vm694_vm10, %v522_v4 }
 0x1a1   : > { %1024 = vmatmul.mubr.msk.f32.vlgmr.msra.gmra.mrb[0].mxu1 %vm694_vm10, %v1018_v54 }
 0x274   : > { %v1025_v3 = vpop.f32.mrb[0].mxu1 }
 0x275   : > { %v777_v10 = vadd.f32 %v1025_v3, %v270_v5  ;;  %v771_v18 = vpop.f32.mrb[1].mxu1 }
 0x276   : > { %v772_v24 = vadd.f32 %v771_v18, %v269_v35 }
 0x277   : > { %v781_v6 = vsub.f32 0.0, %v777_v10 }
 0x278   : > { %v780_v8 = vsub.f32 0.0, %v772_v24 }
 0x279   : > { %v784_v11 = vmul.f32 1.442695, %v781_v6 }
 0x27a   : > { %v782_v12 = vmul.f32 1.442695, %v780_v8 }
 0x27b   : > { %1086 = vpow2.f32 %v784_v11 }
 0x27c   : > { %1088 = vpow2.f32 %v782_v12 }
 0x285   : > { %v1087_v13 = vpop.eup %1086 }
 0x286   : > { %v1089_v14 = vpop.eup %1088  ;;  %v787_v15 = vadd.f32 1.0, %v1087_v13 }
 0x287   : > { %v786_v16 = vadd.f32 1.0, %v1089_v14 }
 0x288   : > { %1090 = vrcp.f32 %v787_v15 }
 0x289   : > { %1092 = vrcp.f32 %v786_v16 }
 0x292   : > { %v1091_v19 = vpop.eup %1090 }
 0x293   : > { %v1093_v20 = vpop.eup %1092 }
 0x294   : > { %v1039_v21 = vpack.c.bf16 %v1091_v19, %v1093_v20 }
 0x296   : > { %1040 = vmatprep.subr.bf16.mxu0 %v1039_v21 }
 0x297   : > { %1042 = vmatpush3.bf16.msra.mxu0 %v1039_v21 }
 0x29a   : > { %1031 = vmatmul.mubr.msk.f32.vlgmr.msra.gmra.mrb[2].mxu0 %vm792_vm12, %v272_v22 }
 0x36d   : > { %v1032_v25 = vpop.f32.mrb[2].mxu0 }
 0x36e   : > { %v875_v26 = vsel %vm792_vm12, %v1032_v25, -inf  ;;  %v865_v27 = vpop.f32.mrb[3].mxu0 }
 0x36f   : > { %v874_v28 = vsel %vm792_vm12, %v865_v27, -inf }
 0x370   : > { %v876_v31 = vmax.f32 %v874_v28, %v875_v26 }
 0x372   : > { %v877_v32 = vrot.slane %v876_v31, 4 }
 0x374   : > { %v878_v33 = vmax.f32 %v876_v31, %v877_v32 }
 0x376   : > { %v879_v34 = vrot.slane %v878_v33, 2 }
 0x378   : > { %v880_v37 = vmax.f32 %v878_v33, %v879_v34 }
 0x37a   : > { %v881_v38 = vrot.slane %v880_v37, 1 }
 0x37c   : > { %v882_v39 = vmax.f32 %v880_v37, %v881_v38 }
 0x37e   : > { %v883_v40 = vsub.f32 %v865_v27, %v882_v39  ;;  %v884_v43 = vsub.f32 %v1032_v25, %v882_v39 }
 0x380   : > { %v885_v44 = vmul.f32 1.442695, %v883_v40  ;;  %v887_v45 = vmul.f32 1.442695, %v884_v43 }
 0x382   : > { %1094 = vpow2.f32 %v885_v44 }
 0x383   : > { %1096 = vpow2.f32 %v887_v45 }
 0x38c   : > { %v1095_v46 = vpop.eup %1094 }
 0x38d   : > { %v1097_v51 = vpop.eup %1096  ;;  %v889_v52 = vsel %vm792_vm12, %v1095_v46, 0.0 }
 0x38e   : > { %v890_v53 = vsel %vm792_vm12, %v1097_v51, 0.0 }
 0x38f   : > { %v891_v55 = vadd.f32 %v890_v53, %v889_v52 }
 0x391   : > { %v892_v60 = vrot.slane %v891_v55, 4 }
 0x393   : > { %v893_v61 = vadd.f32 %v892_v60, %v891_v55 }
 0x395   : > { %v894_v62 = vrot.slane %v893_v61, 2 }
 0x397   : > { %v895_v30 = vadd.f32 %v894_v62, %v893_v61 }
 0x399   : > { %v896_v1 = vrot.slane %v895_v30, 1 }
 0x39b   : > { %v897_v9 = vadd.f32 %v896_v1, %v895_v30 }
 0x39d   : > { %1098 = vrcp.f32 %v897_v9 }
 0x3a7   : > { %v1099_v17 = vpop.eup %1098 }
 0x3a8   : > { %v899_v23 = vmul.f32 %v1099_v17, %v1095_v46  ;;  %v900_v63 = vmul.f32 %v1099_v17, %v1097_v51 }
 0x3aa   : > { %901 = vst.msk [vmem:[%s244_s16] sm:$0xff] %vm792_vm12, %v899_v23  ;;  %902 = vst.msk [vmem:[%s244_s16 + $0x8] sm:$0xff] %vm792_vm12, %v900_v63 }
 0x3ab   : > { %1113 = shalt.err (!%p1110_p3)
}
 0x3ac   : > { %s1114_s10 = scalar_lea.hbm %s1454_s20, 256  ;;  %s1118_s13 = scalar_lea.hbm %s1507_s6, 512 }
 0x3ad   : > { %p1115_p4 = scmp.ne.s32.totalorder %s1454_s20, %s1114_s10  ;;  %p1119_p9 = scmp.lt.u32.totalorder %s1454_s20, %s1507_s6 }
 0x3ae   : > { %p1120_p10 = scmp.lt.u32.totalorder %s1118_s13, %s1114_s10  ;;  %p1122_p12 = scmp.lt.u32.totalorder %s1114_s10, %s1454_s20 }
 0x3af   : > { %p1116_p7 = pnand %p1115_p4, %p1241_p5 }
 0x3b0   : > { %p1121_p11 = por %p1120_p10, %p1119_p9 }
 0x3b1   : > { %p1117_p8 = pneg %p1116_p7 }
 0x3b2   : > { %p1123_p13 = por %p1122_p12, %p1121_p11 }
 0x3b4   : > { %p1124_p0 = pnand %p1123_p13, %p1117_p8 }
 0x3b6   : > { %1127 = shalt.err (!%p1124_p0)
}
 0x3b7   : > { %s1166_s16 = smov 128   ;;  %s1167_s18 = smov 8  }
 0x3b8   : > { %1043 = dma.vmem_to_hbm [thread:$0]  (%p1241_p5), %s1456_s17, 256, %s1454_s20, %s1460_s25, %s1166_s16, %s1166_s16, %s1167_s18  }
 0x3b9 PF: > { %p1049_p1 = scmp.ge.s32.totalorder %s1162_s24, 2  ;;  %s932_s19 = sand.u32 1, %s1150_s21  }
 0x3ba   : > { %s933_s26 = scalar_lea.sflag [#allocation3], %s932_s19 }
 0x3bb   : > { %p1046_p2 = pnand %p1049_p1, %p1245_p6 }
 0x3bd   : > { %1145 = dma.done.wait (!%p1046_p2), %s933_s26, 256  }
 0x3be   : > { %1147 = vsyncadd (!%p1046_p2), %s933_s26, 4294967040  ;;  %p16_p3 = scmp.ge.s32.totalorder %s1228_s27, 4   ;;  %s1510_s21 = smov %s1154_s22 }
 0x3bf   : > { %s1511_s22 = smov %s1158_s23  ;;  %s1512_s23 = smov %s1239_s30 }
 0x3c0   : > { %s1513_s24 = smov %s1228_s27  ;;  %18 = sbr.rel (!%p16_p3) target bundleno = 3 (0x3), region = 79 }
 0x3c7   :  { %938 = vsyncpa [#allocation3], 1 }
 0x3c8   :  { %940 = vsyncpa [#allocation3 + $0x1], 1 }

</bundles_post_ra>
